<compile_context>
chip_gen: v7x
topology: tpu7x:2x2x1
jax: 0.10.0
libtpu: 0.0.40
codegen_flags: <defaults>
</compile_context>

<pallas_src>
import functools

import jax
import jax.numpy as jnp
from jax.experimental import pallas as pl
from jax.experimental.pallas import tpu as pltpu

LANE = 128


def _round_up(x, m):
    return (x + m - 1) // m * m


def _mdd_kernel(x_ref, w0_ref, w1_ref, w2_ref, b0_ref, b1_ref, b2_ref, out_ref):
    cdt = w0_ref.dtype                      # compute dtype (bf16 or f32)

    # trunk: Linear (BatchNorm folded into w0 / b0) -> ReLU
    x = x_ref[...].astype(cdt)
    h = jnp.dot(x, w0_ref[...], preferred_element_type=jnp.float32)
    h = jnp.maximum(h + b0_ref[...], 0.0)   # bias-add / ReLU in f32 (v5e VPU-safe)

    # fused heads (out_1 | out_2) first Linear -> ReLU   (single MXU push)
    h12 = jnp.dot(h.astype(cdt), w1_ref[...], preferred_element_type=jnp.float32)
    h12 = jnp.maximum(h12 + b1_ref[...], 0.0)

    # fused block-diagonal second Linear, unpadded [TB, 2*n_class] output
    out_ref[...] = (jnp.dot(h12.astype(cdt), w2_ref[...],
                            preferred_element_type=jnp.float32)
                    + b2_ref[...]).astype(out_ref.dtype)


def pack_params(params, n_class, compute_dtype=jnp.bfloat16):
    """Fold BN into the first Linear, fuse the two heads, lane-pad hidden dims,
    and cast the weights to the compute dtype (done once, at pack time)."""
    w0, b0 = params["w0"], params["b0"]
    bn_scale, bn_shift = params["bn_scale"], params["bn_shift"]
    w1a, b1a, w2a, b2a = params["w1a"], params["b1a"], params["w2a"], params["b2a"]
    w1b, b1b, w2b, b2b = params["w1b"], params["b1b"], params["w2b"], params["b2b"]

    f0, f1 = w0.shape
    f2 = w1a.shape[1]
    f2x2 = 2 * f2
    f1p = _round_up(f1, LANE)
    f2x2p = _round_up(f2x2, LANE)
    out_w = 2 * n_class

    # fold BatchNorm (eval running stats) into the trunk linear
    w0f = w0 * bn_scale                           # [f0, f1]
    b0f = (b0 * bn_scale + bn_shift)[0]           # [f1]

    # zero-pad lane dims to multiples of 128.  Padded trunk columns get a zero
    # bias -> ReLU -> 0, and the matching rows of the next weight are zero, so
    # the padded result is bit-exact w.r.t. the unpadded computation.
    w0p = jnp.zeros((f0, f1p), jnp.float32).at[:, :f1].set(w0f)
    w1p = (jnp.zeros((f1p, f2x2p), jnp.float32)
           .at[:f1, :f2].set(w1a)
           .at[:f1, f2:f2x2].set(w1b))
    w2p = (jnp.zeros((f2x2p, out_w), jnp.float32)
           .at[:f2, :n_class].set(w2a)
           .at[f2:f2x2, n_class:].set(w2b))

    # biases stay f32 (added to the f32 MXU accumulations)
    b0p = jnp.zeros((1, f1p), jnp.float32).at[0, :f1].set(b0f)
    b1p = (jnp.zeros((1, f2x2p), jnp.float32)
           .at[0, :f2].set(b1a[0])
           .at[0, f2:f2x2].set(b1b[0]))
    b2p = (jnp.zeros((1, out_w), jnp.float32)
           .at[0, :n_class].set(b2a[0])
           .at[0, n_class:].set(b2b[0]))

    return dict(w0=w0p.astype(compute_dtype),
                w1=w1p.astype(compute_dtype),
                w2=w2p.astype(compute_dtype),
                b0=b0p, b1=b1p, b2=b2p)


def _choose_batch_tiling(B, max_tile=1024):
    """Returns (TB, B_pad).  Small batches run as a single grid step (block ==
    full dim, always legal).  Large batches use big tiles (amortize the
    ~600-cycle per-step overhead) but at least 4 grid steps so both v7x
    TensorCores are busy; prefer a tile that divides B exactly so the wrapper
    never pads x."""
    if B <= 256:
        return B, B
    desired = min(max_tile, _round_up(-(-B // 4), 8))
    desired -= desired % 8
    for tb in range(desired, 7, -8):
        if B % tb == 0:
            return tb, B
    # rare ragged batch: tail-pad to a multiple of the desired tile
    # TODO(synk): a masked last grid step would remove this fallback pad.
    return desired, _round_up(B, desired)


def mdd_cls_forward(x, packed, *, n_class, training=False):
    """x: [B, f0].  Returns output (and output_adv when training=True)."""
    B, f0 = x.shape
    w0, w1, w2 = packed["w0"], packed["w1"], packed["w2"]
    b0, b1, b2 = packed["b0"], packed["b1"], packed["b2"]
    f1p = w0.shape[1]
    f2x2p = w1.shape[1]
    out_w = w2.shape[1]                     # 2 * n_class, unpadded

    TB, B_pad = _choose_batch_tiling(B)
    x_in = x if B_pad == B else jnp.pad(x, ((0, B_pad - B), (0, 0)))
    grid = (B_pad // TB,)

    w_isz = w0.dtype.itemsize
    x_isz = x_in.dtype.itemsize
    flops = 2 * B_pad * (f0 * f1p + f1p * f2x2p + f2x2p * out_w)
    bytes_accessed = int(x_in.size * x_isz
                         + (w0.size + w1.size + w2.size) * w_isz
                         + (b0.size + b1.size + b2.size) * 4
                         + B_pad * out_w * 4)

    # VMEM footprint: double-buffered x / out tiles, (double-buffered) resident
    # weights + biases, f32 intermediates.  Raise the scoped limit explicitly
    # (v5e default is only 16 MiB); cap at 64 MiB so we never exceed v7x's
    # physical VMEM.
    vmem_est = (2 * TB * f0 * x_isz
                + 2 * TB * out_w * 4
                + 2 * (w0.size + w1.size + w2.size) * w_isz
                + 2 * (b0.size + b1.size + b2.size) * 4
                + TB * (f1p + f2x2p) * 4)
    vmem_limit = int(min(64 * 2**20, max(32 * 2**20, vmem_est * 3 // 2)))

    out = pl.pallas_call(
        _mdd_kernel,
        out_shape=jax.ShapeDtypeStruct((B_pad, out_w), jnp.float32),
        grid_spec=pl.GridSpec(
            grid=grid,
            in_specs=[
                pl.BlockSpec((TB, f0), lambda i: (i, 0)),    # x: batch-tiled
                pl.BlockSpec(w0.shape, lambda i: (0, 0)),    # w0: VMEM-resident
                pl.BlockSpec(w1.shape, lambda i: (0, 0)),    # fused w1
                pl.BlockSpec(w2.shape, lambda i: (0, 0)),    # fused block-diag w2
                pl.BlockSpec(b0.shape, lambda i: (0, 0)),    # trunk bias (f32)
                pl.BlockSpec(b1.shape, lambda i: (0, 0)),    # head hidden bias
                pl.BlockSpec(b2.shape, lambda i: (0, 0)),    # output bias
            ],
            out_specs=pl.BlockSpec((TB, out_w), lambda i: (i, 0)),
        ),
        compiler_params=pltpu.CompilerParams(
            dimension_semantics=("parallel",),
            vmem_limit_bytes=vmem_limit),
        cost_estimate=pl.CostEstimate(flops=int(flops), transcendentals=0,
                                      bytes_accessed=bytes_accessed),
    )(x_in, w0, w1, w2, b0, b1, b2)

    output = out[:B, :n_class]
    output_adv = out[:B, n_class:]
    if training:
        return output, output_adv
    return output


def init_params(key, feat_size, n_class):
    """Deterministic init mirroring MDDCls.__init__ (feat_size of length 3).
    Weights stored pre-transposed as [in, out] (PyTorch nn.Linear is [out, in])."""
    assert len(feat_size) == 3, "this synthetic setup uses one mlp layer"
    f0, f1, f2 = feat_size
    ks = jax.random.split(key, 6)

    # mlp[0]: weight ~ N(0, 0.005), bias = 0.1
    w0 = 0.005 * jax.random.normal(ks[0], (f0, f1), jnp.float32)
    b0 = jnp.full((1, f1), 0.1, jnp.float32)

    # BatchNorm1d(f1) eval-mode with default state: gamma=1, beta=0,
    # running_mean=0, running_var=1, eps=1e-5  -> folded scale/shift.
    eps = 1e-5
    gamma = jnp.ones((f1,), jnp.float32)
    beta = jnp.zeros((f1,), jnp.float32)
    running_mean = jnp.zeros((f1,), jnp.float32)
    running_var = jnp.ones((f1,), jnp.float32)
    bn_scale = (gamma / jnp.sqrt(running_var + eps)).reshape(1, f1)
    bn_shift = (beta - running_mean * bn_scale.reshape(-1)).reshape(1, f1)

    # out_1 / out_2 linears: weight ~ N(0, 0.01), bias = 0.0
    w1a = 0.01 * jax.random.normal(ks[1], (f1, f2), jnp.float32)
    b1a = jnp.zeros((1, f2), jnp.float32)
    w2a = 0.01 * jax.random.normal(ks[2], (f2, n_class), jnp.float32)
    b2a = jnp.zeros((1, n_class), jnp.float32)

    w1b = 0.01 * jax.random.normal(ks[3], (f1, f2), jnp.float32)
    b1b = jnp.zeros((1, f2), jnp.float32)
    w2b = 0.01 * jax.random.normal(ks[4], (f2, n_class), jnp.float32)
    b2b = jnp.zeros((1, n_class), jnp.float32)

    return dict(w0=w0, b0=b0, bn_scale=bn_scale, bn_shift=bn_shift,
                w1a=w1a, b1a=b1a, w2a=w2a, b2a=b2a,
                w1b=w1b, b1b=b1b, w2b=w2b, b2b=b2b)


def _reference_forward(x, p):
    """Pure-JAX reference (un-fused, un-folded, f32) for correctness checking."""
    h = x @ p["w0"] + p["b0"]
    h = h * p["bn_scale"] + p["bn_shift"]
    h = jnp.maximum(h, 0.0)
    h1 = jnp.maximum(h @ p["w1a"] + p["b1a"], 0.0)
    out1 = h1 @ p["w2a"] + p["b2a"]
    h2 = jnp.maximum(h @ p["w1b"] + p["b1b"], 0.0)
    out2 = h2 @ p["w2b"] + p["b2b"]
    return out1, out2


if __name__ == "__main__":
    # Small, module-consistent shapes: feat_size = [16, 32, 32], n_class = 8, batch = 8.
    feat_size = [16, 32, 32]
    n_class = 8
    batch = 8

    key = jax.random.PRNGKey(0)
    kx, kp = jax.random.split(key)
    x = jax.random.normal(kx, (batch, feat_size[0]), jnp.float32)
    params = init_params(kp, feat_size, n_class)
    ref1, ref2 = _reference_forward(x, params)

    fwd_train = jax.jit(functools.partial(mdd_cls_forward, n_class=n_class,
                                          training=True))
    fwd_eval = jax.jit(functools.partial(mdd_cls_forward, n_class=n_class,
                                         training=False))

    # f32 path: exactness check against the reference.
    packed_f32 = pack_params(params, n_class, compute_dtype=jnp.float32)
    o32, oa32 = fwd_train(x, packed_f32)
    jax.block_until_ready((o32, oa32))
    assert o32.shape == (batch, n_class) and oa32.shape == (batch, n_class)
    assert jnp.allclose(o32, ref1, atol=1e-5, rtol=1e-5)
    assert jnp.allclose(oa32, ref2, atol=1e-5, rtol=1e-5)

    # bf16 path (bandwidth-optimized default): looser tolerance for the cast.
    packed_bf16 = pack_params(params, n_class, compute_dtype=jnp.bfloat16)
    o16, oa16 = fwd_train(x, packed_bf16)
    jax.block_until_ready((o16, oa16))
    assert jnp.allclose(o16, ref1, atol=1e-4, rtol=5e-2)
    assert jnp.allclose(oa16, ref2, atol=1e-4, rtol=5e-2)

    # eval-mode returns only `output`
    o_eval = fwd_eval(x, packed_bf16)
    jax.block_until_ready(o_eval)
    assert o_eval.shape == (batch, n_class)

    print("KERNEL_OK")
</pallas_src>

<mosaic_0001>
module attributes {stable_mosaic.version = 11 : i64} {
  func.func @_mdd_kernel(%arg0: i32, %arg1: memref<8x16xf32, #tpu.memory_space<vmem>>, %arg2: memref<16x128xf32, #tpu.memory_space<vmem>>, %arg3: memref<128x128xf32, #tpu.memory_space<vmem>>, %arg4: memref<128x16xf32, #tpu.memory_space<vmem>>, %arg5: memref<1x128xf32, #tpu.memory_space<vmem>>, %arg6: memref<1x128xf32, #tpu.memory_space<vmem>>, %arg7: memref<1x16xf32, #tpu.memory_space<vmem>>, %arg8: memref<8x16xf32, #tpu.memory_space<vmem>>) attributes {dimension_semantics = [#tpu.dimension_semantics<parallel>], iteration_bounds = array<i64: 1>, scalar_prefetch = 0 : i64, scratch_operands = 0 : i64, tpu.core_type = #tpu.core_type<tc>, window_params = [{transform_indices = @transform_0, window_bounds = array<i64: 8, 16>}, {pipeline_mode = #tpu.pipeline_mode<synchronous>, transform_indices = @transform_1, window_bounds = array<i64: 16, 128>}, {pipeline_mode = #tpu.pipeline_mode<synchronous>, transform_indices = @transform_2, window_bounds = array<i64: 128, 128>}, {pipeline_mode = #tpu.pipeline_mode<synchronous>, transform_indices = @transform_3, window_bounds = array<i64: 128, 16>}, {pipeline_mode = #tpu.pipeline_mode<synchronous>, transform_indices = @transform_4, window_bounds = array<i64: 1, 128>}, {pipeline_mode = #tpu.pipeline_mode<synchronous>, transform_indices = @transform_5, window_bounds = array<i64: 1, 128>}, {pipeline_mode = #tpu.pipeline_mode<synchronous>, transform_indices = @transform_6, window_bounds = array<i64: 1, 16>}, {transform_indices = @transform_7, window_bounds = array<i64: 8, 16>}]} {
    %c0 = arith.constant 0 : index
    %c0_0 = arith.constant 0 : index
    %0 = vector.load %arg1[%c0, %c0_0] : memref<8x16xf32, #tpu.memory_space<vmem>>, vector<8x16xf32>
    %c0_1 = arith.constant 0 : index
    %c0_2 = arith.constant 0 : index
    %1 = vector.load %arg2[%c0_1, %c0_2] : memref<16x128xf32, #tpu.memory_space<vmem>>, vector<16x128xf32>
    %cst = arith.constant dense<0.000000e+00> : vector<8x128xf32>
    %2 = tpu.matmul %0, %1, %cst {dimension_numbers = #tpu.dot_dimension_numbers<[1], [0], [0], [1], [0, 0, 1, 1], [], []>} : vector<8x16xf32>, vector<16x128xf32>, vector<8x128xf32> -> vector<8x128xf32>
    %c0_3 = arith.constant 0 : index
    %c0_4 = arith.constant 0 : index
    %3 = vector.load %arg5[%c0_3, %c0_4] : memref<1x128xf32, #tpu.memory_space<vmem>>, vector<1x128xf32>
    %4 = vector.broadcast %3 : vector<1x128xf32> to vector<8x128xf32>
    %5 = arith.addf %2, %4 : vector<8x128xf32>
    %cst_5 = arith.constant 0.000000e+00 : f32
    %6 = vector.broadcast %cst_5 : f32 to vector<8x128xf32>
    %7 = arith.maximumf %5, %6 : vector<8x128xf32>
    %c0_6 = arith.constant 0 : index
    %c0_7 = arith.constant 0 : index
    %8 = vector.load %arg3[%c0_6, %c0_7] : memref<128x128xf32, #tpu.memory_space<vmem>>, vector<128x128xf32>
    %cst_8 = arith.constant dense<0.000000e+00> : vector<8x128xf32>
    %9 = tpu.matmul %7, %8, %cst_8 {dimension_numbers = #tpu.dot_dimension_numbers<[1], [0], [0], [1], [0, 0, 1, 1], [], []>} : vector<8x128xf32>, vector<128x128xf32>, vector<8x128xf32> -> vector<8x128xf32>
    %c0_9 = arith.constant 0 : index
    %c0_10 = arith.constant 0 : index
    %10 = vector.load %arg6[%c0_9, %c0_10] : memref<1x128xf32, #tpu.memory_space<vmem>>, vector<1x128xf32>
    %11 = vector.broadcast %10 : vector<1x128xf32> to vector<8x128xf32>
    %12 = arith.addf %9, %11 : vector<8x128xf32>
    %cst_11 = arith.constant 0.000000e+00 : f32
    %13 = vector.broadcast %cst_11 : f32 to vector<8x128xf32>
    %14 = arith.maximumf %12, %13 : vector<8x128xf32>
    %c0_12 = arith.constant 0 : index
    %c0_13 = arith.constant 0 : index
    %15 = vector.load %arg4[%c0_12, %c0_13] : memref<128x16xf32, #tpu.memory_space<vmem>>, vector<128x16xf32>
    %cst_14 = arith.constant dense<0.000000e+00> : vector<8x16xf32>
    %16 = tpu.matmul %14, %15, %cst_14 {dimension_numbers = #tpu.dot_dimension_numbers<[1], [0], [0], [1], [0, 0, 1, 1], [], []>} : vector<8x128xf32>, vector<128x16xf32>, vector<8x16xf32> -> vector<8x16xf32>
    %c0_15 = arith.constant 0 : index
    %c0_16 = arith.constant 0 : index
    %17 = vector.load %arg7[%c0_15, %c0_16] : memref<1x16xf32, #tpu.memory_space<vmem>>, vector<1x16xf32>
    %18 = vector.broadcast %17 : vector<1x16xf32> to vector<8x16xf32>
    %19 = arith.addf %16, %18 : vector<8x16xf32>
    %c0_17 = arith.constant 0 : index
    %c0_18 = arith.constant 0 : index
    %20 = vector.load %arg8[%c0_17, %c0_18] : memref<8x16xf32, #tpu.memory_space<vmem>>, vector<8x16xf32>
    tpu.vector_store %arg8[%c0_17, %c0_18], %19 {strides = array<i32>} : memref<8x16xf32, #tpu.memory_space<vmem>>, vector<8x16xf32>,
    return
  }
  func.func @transform_0(%arg0: i32) -> (i32, i32) {
    %c0_i32 = arith.constant 0 : i32
    %c0_i32_0 = arith.constant 0 : i32
    return %arg0, %c0_i32 : i32, i32
  }
  func.func @transform_1(%arg0: i32) -> (i32, i32) {
    %c0_i32 = arith.constant 0 : i32
    %c0_i32_0 = arith.constant 0 : i32
    %c0_i32_1 = arith.constant 0 : i32
    return %c0_i32, %c0_i32_0 : i32, i32
  }
  func.func @transform_2(%arg0: i32) -> (i32, i32) {
    %c0_i32 = arith.constant 0 : i32
    %c0_i32_0 = arith.constant 0 : i32
    %c0_i32_1 = arith.constant 0 : i32
    return %c0_i32, %c0_i32_0 : i32, i32
  }
  func.func @transform_3(%arg0: i32) -> (i32, i32) {
    %c0_i32 = arith.constant 0 : i32
    %c0_i32_0 = arith.constant 0 : i32
    %c0_i32_1 = arith.constant 0 : i32
    return %c0_i32, %c0_i32_0 : i32, i32
  }
  func.func @transform_4(%arg0: i32) -> (i32, i32) {
    %c0_i32 = arith.constant 0 : i32
    %c0_i32_0 = arith.constant 0 : i32
    %c0_i32_1 = arith.constant 0 : i32
    return %c0_i32, %c0_i32_0 : i32, i32
  }
  func.func @transform_5(%arg0: i32) -> (i32, i32) {
    %c0_i32 = arith.constant 0 : i32
    %c0_i32_0 = arith.constant 0 : i32
    %c0_i32_1 = arith.constant 0 : i32
    return %c0_i32, %c0_i32_0 : i32, i32
  }
  func.func @transform_6(%arg0: i32) -> (i32, i32) {
    %c0_i32 = arith.constant 0 : i32
    %c0_i32_0 = arith.constant 0 : i32
    %c0_i32_1 = arith.constant 0 : i32
    return %c0_i32, %c0_i32_0 : i32, i32
  }
  func.func @transform_7(%arg0: i32) -> (i32, i32) {
    %c0_i32 = arith.constant 0 : i32
    %c0_i32_0 = arith.constant 0 : i32
    return %arg0, %c0_i32 : i32, i32
  }
}

</mosaic_0001>

<bundles_post_ra>
// kernel: mdd_cls_forward.1
= control target key start
LH: loop header
LB: loop body
LE: loop exit
PB: predicated region body
PF: predicated region fallthrough
CT: control target
= control target key end

     0   :  { %12 = vsyncpa [#allocation3], 0  ;;  %s513_s24 = smov [#allocation2]   ;;  %s705_s0 = inlined_call_operand.hbm [shape: f32[8,16], index: 0, kind: input, shape index: {}]   ;;  %s706_s1 = inlined_call_operand.vmem [shape: f32[16,128], index: 1, kind: input, shape index: {}]   ;;  %s707_s2 = inlined_call_operand.vmem [shape: f32[128,128], index: 2, kind: input, shape index: {}]   ;;  %s708_s3 = inlined_call_operand.vmem [shape: f32[128,16], index: 3, kind: input, shape index: {}]   ;;  %s709_s4 = inlined_call_operand.vmem [shape: f32[1,128], index: 4, kind: input, shape index: {}]   ;;  %s710_s5 = inlined_call_operand.vmem [shape: f32[1,128], index: 5, kind: input, shape index: {}]   ;;  %s711_s6 = inlined_call_operand.vmem [shape: f32[1,16], index: 6, kind: input, shape index: {}]   ;;  %s712_s7 = inlined_call_operand.vmem [shape: f32[8,16], index: 7, kind: output, shape index: {}]  }
   0x1   :  { %s19_s25 = sshll.u32 %s513_s24, 4  ;;  %s489_s28 = scalar_lea.hbm %s705_s0, 128  ;;  %s20_s25 = int_to_ptr.vmem [resolvable:$true] %s19_s25 }
   0x2   :  { %p490_p0 = scmp.ne.s32.totalorder %s705_s0, %s489_s28  ;;  %p493_p1 = scmp.lt.u32.totalorder %s489_s28, %s705_s0 }
   0x4   :  { %p495_p2 = pnand %p493_p1, %p490_p0 }
   0x6   :  { %498 = shalt.err (!%p495_p2)
}
   0x7   :  { %s499_s10 = scalar_lea.vmem %s20_s25, 128  ;;  %p504_p4 = scmp.lt.s32.totalorder %s20_s25, %s20_s25 }
   0x8   :  { %p500_p3 = scmp.ne.s32.totalorder %s20_s25, %s499_s10  ;;  %p505_p5 = scmp.lt.s32.totalorder %s499_s10, %s499_s10 }
   0xa   :  { %p506_p6 = por %p505_p5, %p504_p4 }
   0xc   :  { %p507_p7 = pnand %p506_p6, %p500_p3 }
   0xe   :  { %510 = shalt.err (!%p507_p7)
}
   0xf   :  { %22 = dma.hbm_to_vmem [thread:$0]  %s705_s0, 128, %s20_s25, [#allocation3]  }
  0x10   :  { %511 = dma.done.wait [#allocation3], 128  }
  0x11   :  { %512 = vsyncadd [#allocation3], 4294967168  ;;  %v514_v0 = vmov 0.0|0.0   ;;  %vm515_vm0 = vmmov 0   ;;  %v516_v1 = vmov 0.0   ;;  %v39_v2 = vld [vmem:[%s706_s1] sm:$0xff] }
  0x12   :  { %434 = vmatprep.subr.bf16.mxu0 %v514_v0  ;;  %361 = vmatprep.mubr.msk.f32.mxu0 %vm515_vm0, %v516_v1  ;;  %v40_v3 = vld [vmem:[%s706_s1 + $0x8] sm:$0xff]  ;;  %v123_v5 = vld [vmem:[%s707_s2] sm:$0xff]  ;;  %v125_v7 = vld [vmem:[%s707_s2 + $0x10] sm:$0xff]  ;;  %vm48_vm1 = vcmask 130048  }
  0x13   :  { %437 = vmatprep.subr.bf16.mxu1 %v514_v0  ;;  %396 = vmatprep.mubr.msk.f32.mxu1 %vm515_vm0, %v516_v1  ;;  %v435_v4 = vpack.c.bf16 %v40_v3, %v39_v2  ;;  %v124_v6 = vld [vmem:[%s707_s2 + $0x8] sm:$0xff]  ;;  %v126_v9 = vld [vmem:[%s707_s2 + $0x18] sm:$0xff]  ;;  %v38_v10 = vld [vmem:[#allocation2] sm:$0xff] }
  0x14   :  { %v438_v8 = vpack.c.bf16 %v124_v6, %v123_v5  ;;  %v441_v11 = vpack.c.bf16 %v126_v9, %v125_v7  ;;  %v127_v12 = vld [vmem:[%s707_s2 + $0x20] sm:$0xff]  ;;  %v128_v13 = vld [vmem:[%s707_s2 + $0x28] sm:$0xff]  ;;  %v129_v15 = vld [vmem:[%s707_s2 + $0x30] sm:$0xff] }
  0x15   :  { %436 = vmatpush3.bf16.msra.mxu0 %v435_v4  ;;  %v444_v14 = vpack.c.bf16 %v128_v13, %v127_v12  ;;  %v130_v16 = vld [vmem:[%s707_s2 + $0x38] sm:$0xff]  ;;  %v131_v18 = vld [vmem:[%s707_s2 + $0x40] sm:$0xff]  ;;  %v132_v19 = vld [vmem:[%s707_s2 + $0x48] sm:$0xff] }
  0x16   :  { %439 = vmatpush3.bf16.msra.mxu1 %v438_v8  ;;  %461 = vmatprep.subr.bf16.mxu0 %v514_v0  ;;  %v447_v17 = vpack.c.bf16 %v130_v16, %v129_v15  ;;  %v450_v20 = vpack.c.bf16 %v132_v19, %v131_v18  ;;  %v133_v21 = vld [vmem:[%s707_s2 + $0x50] sm:$0xff]  ;;  %v134_v22 = vld [vmem:[%s707_s2 + $0x58] sm:$0xff]  ;;  %v135_v24 = vld [vmem:[%s707_s2 + $0x60] sm:$0xff] }
  0x17   :  { %440 = vmatprep.subr.bf16.mxu1 %v514_v0  ;;  %v453_v23 = vpack.c.bf16 %v134_v22, %v133_v21  ;;  %v136_v25 = vld [vmem:[%s707_s2 + $0x68] sm:$0xff]  ;;  %v137_v27 = vld [vmem:[%s707_s2 + $0x70] sm:$0xff]  ;;  %v138_v28 = vld [vmem:[%s707_s2 + $0x78] sm:$0xff] }
  0x18   :  { %362 = vmatmul.mubr.msk.f32.vlgmr.msra.gmra.mrb[0].mxu0 %vm48_vm1, %v38_v10  ;;  %v456_v26 = vpack.c.bf16 %v136_v25, %v135_v24  ;;  %v459_v29 = vpack.c.bf16 %v138_v28, %v137_v27  ;;  %v217_v30 = vld [vmem:[%s708_s3] sm:$0xff]  ;;  %v218_v31 = vld [vmem:[%s708_s3 + $0x8] sm:$0xff]  ;;  %v219_v32 = vld [vmem:[%s708_s3 + $0x10] sm:$0xff] }
  0x19   :  { %431 = vmatprep.mubr.msk.f32.mxu0 %vm515_vm0, %v516_v1  ;;  %v462_v33 = vpack.c.bf16 %v218_v31, %v217_v30  ;;  %v220_v34 = vld [vmem:[%s708_s3 + $0x18] sm:$0xff]  ;;  %v221_v36 = vld [vmem:[%s708_s3 + $0x20] sm:$0xff]  ;;  %v222_v37 = vld [vmem:[%s708_s3 + $0x28] sm:$0xff] }
  0x1a   :  { %442 = vmatpush3.bf16.msra.mxu1 %v441_v11  ;;  %v465_v35 = vpack.c.bf16 %v220_v34, %v219_v32  ;;  %v468_v38 = vpack.c.bf16 %v222_v37, %v221_v36  ;;  %v223_v39 = vld [vmem:[%s708_s3 + $0x30] sm:$0xff]  ;;  %v224_v40 = vld [vmem:[%s708_s3 + $0x38] sm:$0xff]  ;;  %v225_v42 = vld [vmem:[%s708_s3 + $0x40] sm:$0xff] }
  0x1b   :  { %443 = vmatprep.subr.bf16.mxu1 %v514_v0  ;;  %463 = vmatpush3.bf16.msra.mxu0 %v462_v33  ;;  %v471_v41 = vpack.c.bf16 %v224_v40, %v223_v39  ;;  %v226_v43 = vld [vmem:[%s708_s3 + $0x48] sm:$0xff]  ;;  %v227_v45 = vld [vmem:[%s708_s3 + $0x50] sm:$0xff]  ;;  %v228_v46 = vld [vmem:[%s708_s3 + $0x58] sm:$0xff] }
  0x1c   :  { %464 = vmatprep.subr.bf16.mxu0 %v514_v0  ;;  %v474_v44 = vpack.c.bf16 %v226_v43, %v225_v42  ;;  %v477_v47 = vpack.c.bf16 %v228_v46, %v227_v45  ;;  %v229_v48 = vld [vmem:[%s708_s3 + $0x60] sm:$0xff]  ;;  %v230_v49 = vld [vmem:[%s708_s3 + $0x68] sm:$0xff]  ;;  %v231_v56 = vld [vmem:[%s708_s3 + $0x70] sm:$0xff] }
  0x1d   :  { %v480_v50 = vpack.c.bf16 %v230_v49, %v229_v48  ;;  %v316_v51 = vld [vmem:[%s709_s4] ss:$0 sm:$0xff]  ;;  %v232_v57 = vld [vmem:[%s708_s3 + $0x78] sm:$0xff] }
  0x1e   :  { %445 = vmatpush3.bf16.msra.mxu1 %v444_v14  ;;  %v483_v58 = vpack.c.bf16 %v232_v57, %v231_v56  ;;  %v318_v59 = vld [vmem:[%s710_s5] ss:$0 sm:$0xff] }
  0x1f   :  { %446 = vmatprep.subr.bf16.mxu1 %v514_v0  ;;  %466 = vmatpush3.bf16.msra.mxu0 %v465_v35 }
  0x20   :  { %467 = vmatprep.subr.bf16.mxu0 %v514_v0 }
  0x22   :  { %448 = vmatpush3.bf16.msra.mxu1 %v447_v17 }
  0x23   :  { %449 = vmatprep.subr.bf16.mxu1 %v514_v0  ;;  %469 = vmatpush3.bf16.msra.mxu0 %v468_v38 }
  0x24   :  { %470 = vmatprep.subr.bf16.mxu0 %v514_v0 }
  0x26   :  { %451 = vmatpush3.bf16.msra.mxu1 %v450_v20 }
  0x27   :  { %452 = vmatprep.subr.bf16.mxu1 %v514_v0  ;;  %472 = vmatpush3.bf16.msra.mxu0 %v471_v41 }
  0x28   :  { %473 = vmatprep.subr.bf16.mxu0 %v514_v0 }
  0x2a   :  { %454 = vmatpush3.bf16.msra.mxu1 %v453_v23 }
  0x2b   :  { %455 = vmatprep.subr.bf16.mxu1 %v514_v0  ;;  %475 = vmatpush3.bf16.msra.mxu0 %v474_v44 }
  0x2c   :  { %476 = vmatprep.subr.bf16.mxu0 %v514_v0 }
  0x2e   :  { %457 = vmatpush3.bf16.msra.mxu1 %v456_v26 }
  0x2f   :  { %458 = vmatprep.subr.bf16.mxu1 %v514_v0  ;;  %478 = vmatpush3.bf16.msra.mxu0 %v477_v47 }
  0x30   :  { %479 = vmatprep.subr.bf16.mxu0 %v514_v0 }
  0x32   :  { %460 = vmatpush3.bf16.msra.mxu1 %v459_v29 }
  0x33   :  { %481 = vmatpush3.bf16.msra.mxu0 %v480_v50 }
  0x34   :  { %482 = vmatprep.subr.bf16.mxu0 %v514_v0  ;;  %v319_v0 = vld [vmem:[%s711_s6] ss:$0 sm:$0xff] }
  0x37   :  { %484 = vmatpush3.bf16.msra.mxu0 %v483_v58 }
  0xeb   :  { %v118_v52 = vpop.f32.mrb[0].mxu0 }
  0xec   :  { %v119_v53 = vadd.f32 %v316_v51, %v118_v52  ;;  %v363_v54 = vpop.f32.mrb[1].mxu0 }
  0xee   :  { %v122_v55 = vmax.f32 %v119_v53, 0.0 }
  0xf0   :  { %397 = vmatmul.mubr.f32.vlgmr.msra.gmra.mrb[0].mxu1 %v122_v55 }
 0x1c3   :  { %v212_v60 = vpop.f32.mrb[0].mxu1 }
 0x1c4   :  { %v213_v61 = vadd.f32 %v318_v59, %v212_v60  ;;  %v398_v62 = vpop.f32.mrb[1].mxu1 }
 0x1c6   :  { %v216_v63 = vmax.f32 %v213_v61, 0.0 }
 0x1c8   :  { %432 = vmatmul.mubr.f32.vlgmr.msra.gmra.mrb[2].mxu0 %v216_v63 }
 0x29b   :  { %v306_v1 = vpop.f32.mrb[2].mxu0 }
 0x29c   :  { %v307_v2 = vadd.f32 %v319_v0, %v306_v1  ;;  %v433_v3 = vpop.f32.mrb[3].mxu0 }
 0x29e   :  { %310 = vst.msk [vmem:[%s712_s7] sm:$0xff] %vm48_vm1, %v307_v2 }
 0x29f   :  { %315 = vsyncpa [#allocation3], 1 }

</bundles_post_ra>
